<compile_context>
chip_gen: v7x
topology: tpu7x:2x2x1
jax: 0.10.0
libtpu: 0.0.40
codegen_flags: <defaults>
</compile_context>

<pallas_src>
import jax
import jax.numpy as jnp
from jax.experimental import pallas as pl
from jax.experimental.pallas import tpu as pltpu


def lstm_fc_kernel(xm_ref, xa_ref, wm_ref, wa_ref, whh_ref, b_ref,
                   wfc_ref, bfc_ref, out_ref):
    """Full LSTM recurrence + final Linear on h_T (single invocation).

    xm_ref / xa_ref hold time-major-flattened activations (S*B, I_*), so
    timestep t is rows [t*B, (t+1)*B) — a contiguous, sublane-aligned block
    (B is padded to 8), making the per-step slice a cheap leading-axis pick.

    Kernel weights/bias arrive with the i/f/o gate columns pre-scaled by 0.5
    (see prepare_kernel_params), so the tanh-identity sigmoid needs no
    per-step pre-scale on the serial critical path.
    """
    H = whh_ref.shape[0]
    O = wfc_ref.shape[1]
    B = out_ref.shape[0]
    S = xm_ref.shape[0] // B

    # ---- Hoisted input projection: MXU matmuls for all timesteps at once,
    #      bias folded in once (removed from the latency-critical loop). ----
    gx = (jnp.dot(xm_ref[...], wm_ref[...], preferred_element_type=jnp.float32)
          + jnp.dot(xa_ref[...], wa_ref[...], preferred_element_type=jnp.float32)
          + b_ref[...])                                          # (S*B, 4H)

    # Loop-invariant load hoisted out of the recurrence.
    w_hh = whh_ref[...]                                          # (H, 4H)

    # Hoisted post-tanh affine (scale, offset) per gate block:
    #   i, f, o blocks (weights pre-scaled by 0.5): sigmoid via 0.5*(tanh+1)
    #   g block:                                    plain tanh
    col = jax.lax.broadcasted_iota(jnp.int32, (B, 4 * H), 1)
    is_g = jnp.logical_and(col >= 2 * H, col < 3 * H)
    scale = jnp.where(is_g, 1.0, 0.5).astype(jnp.float32)
    offset = jnp.where(is_g, 0.0, 0.5).astype(jnp.float32)

    h = jnp.zeros((B, H), dtype=jnp.float32)
    c = jnp.zeros((B, H), dtype=jnp.float32)

    # S is small and static -> full static unroll; gate slices stay static
    # and per-iteration scalar/branch overhead disappears.
    # TODO(synk): for hydrology-scale S (hundreds), switch to
    # lax.fori_loop(..., unroll=4..8) and chunk the hoisted gx projection
    # over S so the (S*B, 4H) slab stays inside v7x's 64 MiB VMEM.
    for t in range(S):
        # TODO(synk): hold w_hh stationary in the MXU weight registers across
        # the unrolled loop via pltpu.matmul_push_rhs / matmul_acc_lhs /
        # matmul_pop (removes the per-step RHS re-push from the serial chain).
        gates = gx[t * B:(t + 1) * B] + jnp.dot(
            h, w_hh, preferred_element_type=jnp.float32)         # (B, 4H)
        # One EUP pass over the full (B, 4H) vreg + one full-width FMA.
        tz = jnp.tanh(gates)
        act = scale * tz + offset
        # TODO(synk): at production H, reduce quarter-width lane slices
        # (e.g. pltpu.roll-based i*g) / pick H so per-gate tiles are >=128
        # lanes; at H=32 the slices are a negligible tail.
        i_g = act[:, 0 * H:1 * H]
        f_g = act[:, 1 * H:2 * H]
        g_g = act[:, 2 * H:3 * H]
        o_g = act[:, 3 * H:4 * H]
        c = f_g * c + i_g * g_g
        h = o_g * jnp.tanh(c)

    # Packed, single output slab: [ h_n | c_n | fc(h_T) ] along lanes.
    out_ref[:, 0:H] = h
    out_ref[:, H:2 * H] = c
    out_ref[:, 2 * H:2 * H + O] = (
        jnp.dot(h, wfc_ref[...], preferred_element_type=jnp.float32)
        + bfc_ref[...])


def lstm_forward(x_m, x_a, kernel_params):
    """Glue: pad / time-major flatten in JAX; hot path in Pallas."""
    w_m, w_a, whh_s, b_s, wfc_t, bfc = kernel_params
    x_m = x_m.astype(jnp.float32)
    x_a = x_a.astype(jnp.float32)
    B, S, Im = x_m.shape
    Ia = x_a.shape[-1]
    H = whh_s.shape[0]
    O = wfc_t.shape[1]

    # Pad batch to the f32 sublane count (8): the recurrence is latency-bound,
    # so the padding is free, and it avoids sub-sublane masking on every vreg.
    Bp = ((B + 7) // 8) * 8
    if Bp != B:
        pad = ((0, Bp - B), (0, 0), (0, 0))
        x_m = jnp.pad(x_m, pad)
        x_a = jnp.pad(x_a, pad)

    # Time-major flatten so timestep t is a contiguous sublane-aligned block.
    xm_tm = jnp.transpose(x_m, (1, 0, 2)).reshape(S * Bp, Im)
    xa_tm = jnp.transpose(x_a, (1, 0, 2)).reshape(S * Bp, Ia)

    # Advisory cost hint so XLA schedules the surrounding pad/transpose/slice
    # ops sensibly around this tiny, launch/latency-bound custom call.
    flops = (2 * S * Bp * (Im + Ia) * 4 * H      # hoisted input projection
             + 2 * S * Bp * H * 4 * H            # recurrent h @ W_hh
             + 2 * Bp * H * O)                   # final fc
    transcendentals = S * Bp * (4 * H + H)       # gate tanh + tanh(c)
    bytes_accessed = 4 * (S * Bp * (Im + Ia)
                          + (Im + Ia + H) * 4 * H + 4 * H
                          + H * O + O
                          + Bp * (2 * H + O))

    vmem = pl.BlockSpec(memory_space=pltpu.MemorySpace.VMEM)
    packed = pl.pallas_call(
        lstm_fc_kernel,
        out_shape=jax.ShapeDtypeStruct((Bp, 2 * H + O), jnp.float32),
        in_specs=[vmem] * 8,
        out_specs=vmem,
        cost_estimate=pl.CostEstimate(flops=flops,
                                      transcendentals=transcendentals,
                                      bytes_accessed=bytes_accessed),
    )(xm_tm, xa_tm, w_m, w_a, whh_s, b_s, wfc_t, bfc)

    # TODO(synk): for production batch sizes (B >> 8) add a batch-tile grid
    # with dimension_semantics=("parallel",) so v7x's two TensorCores split
    # the batch, target 256-wide MXU tiles on v6e/v7x, and size tiles against
    # v5e's 16 MiB scoped-VMEM default.
    hn = packed[:B, 0:H]
    cn = packed[:B, H:2 * H]
    y = packed[:B, 2 * H:2 * H + O]

    # PyTorch nn.LSTM state: (h_n, c_n), each (num_layers=1, batch, hidden).
    return y, (hn[None], cn[None])


def init_params(key, mass_in, aux_in, hidden, out, initial_forget_bias=0):
    """Deterministic parameter init mirroring the module's reset_parameters.

    Returns the 'semantic' (unscaled) parameters used by the pure-JAX
    reference; kernel-layout params come from prepare_kernel_params.
    """
    I = mass_in + aux_in
    k1, k2 = jax.random.split(key)
    # TODO(synk): nn.init.orthogonal_ on weight_ih views approximated with a
    # deterministic scaled-normal init (forward semantics are unaffected).
    wih = jax.random.normal(k1, (4 * hidden, I), jnp.float32) / jnp.sqrt(I)
    # nn.init.eye_ on each (H, H) view of weight_hh_l0 -> stacked identities.
    whh = jnp.concatenate([jnp.eye(hidden, dtype=jnp.float32)] * 4, axis=0)
    b_ih = jnp.zeros((4 * hidden,), jnp.float32)
    if initial_forget_bias:
        b_ih = b_ih.at[hidden:2 * hidden].set(float(initial_forget_bias))
    b_hh = jnp.zeros((4 * hidden,), jnp.float32)
    # fc: kaiming_uniform_(nonlinearity='linear') => U(-sqrt(3/fan_in), +sqrt(3/fan_in))
    bound = (3.0 / hidden) ** 0.5
    wfc = jax.random.uniform(k2, (out, hidden), jnp.float32, -bound, bound)
    bfc = jnp.zeros((out,), jnp.float32)
    # Pre-transpose to (in, out); biases as (1, N) rows.
    return (wih.T, whh.T, (b_ih + b_hh)[None, :], wfc.T, bfc[None, :])


def prepare_kernel_params(params, mass_in):
    """One-time host prep of kernel-layout parameters.

    * splits W_ih into its mass / aux row blocks (no runtime concat needed),
    * pre-scales the i/f/o gate columns of W_ih, W_hh and the combined bias
      by 0.5 so the tanh-identity sigmoid needs no per-step pre-scale.
    """
    wih_t, whh_t, b, wfc_t, bfc = params
    H = whh_t.shape[0]
    gate_scale = jnp.concatenate([
        jnp.full((H,), 0.5, jnp.float32),    # i
        jnp.full((H,), 0.5, jnp.float32),    # f
        jnp.ones((H,), jnp.float32),         # g (plain tanh)
        jnp.full((H,), 0.5, jnp.float32),    # o
    ])[None, :]                              # (1, 4H)
    wih_s = wih_t * gate_scale
    whh_s = whh_t * gate_scale
    b_s = b * gate_scale
    w_m = wih_s[:mass_in]
    w_a = wih_s[mass_in:]
    return (w_m, w_a, whh_s, b_s, wfc_t, bfc)


def reference_forward(x_m, x_a, params):
    """Pure-JAX reference of the same PyTorch semantics (correctness check)."""
    wih_t, whh_t, b, wfc_t, bfc = params
    x = jnp.transpose(jnp.concatenate([x_m, x_a], axis=-1), (1, 0, 2))
    S, B, _ = x.shape
    H = whh_t.shape[0]

    def step(carry, x_t):
        h, c = carry
        g = x_t @ wih_t + h @ whh_t + b
        i, f, gg, o = jnp.split(g, 4, axis=-1)
        c = jax.nn.sigmoid(f) * c + jax.nn.sigmoid(i) * jnp.tanh(gg)
        h = jax.nn.sigmoid(o) * jnp.tanh(c)
        return (h, c), None

    init = (jnp.zeros((B, H), jnp.float32), jnp.zeros((B, H), jnp.float32))
    (h, c), _ = jax.lax.scan(step, init, x)
    return h @ wfc_t + bfc, h, c


if __name__ == "__main__":
    cfg = dict(mass_input_size=6, aux_input_size=4, hidden_size=32,
               out_size=3, initial_forget_bias=0)
    B, S = 2, 8

    key = jax.random.PRNGKey(0)
    kp, km, ka = jax.random.split(key, 3)
    params = init_params(kp, cfg['mass_input_size'], cfg['aux_input_size'],
                         cfg['hidden_size'], cfg['out_size'],
                         cfg['initial_forget_bias'])
    kparams = prepare_kernel_params(params, cfg['mass_input_size'])

    x_m = jax.random.normal(km, (B, S, cfg['mass_input_size']), jnp.float32)
    x_a = jax.random.normal(ka, (B, S, cfg['aux_input_size']), jnp.float32)

    fwd = jax.jit(lambda a, b: lstm_forward(a, b, kparams))
    y, (h_n, c_n) = fwd(x_m, x_a)
    jax.block_until_ready((y, h_n, c_n))

    y_ref, h_ref, c_ref = reference_forward(x_m, x_a, params)
    assert y.shape == (B, cfg['out_size'])
    assert h_n.shape == (1, B, cfg['hidden_size'])
    assert c_n.shape == (1, B, cfg['hidden_size'])
    # Tolerance loosened slightly: sigmoid is computed via the tanh identity
    # on-device (mathematically exact, numerically a few-ulp difference).
    assert jnp.allclose(y, y_ref, atol=1e-4, rtol=1e-4)
    assert jnp.allclose(h_n[0], h_ref, atol=1e-4, rtol=1e-4)
    assert jnp.allclose(c_n[0], c_ref, atol=1e-4, rtol=1e-4)

    print("KERNEL_OK")
</pallas_src>

<mosaic_0001>
module attributes {stable_mosaic.version = 11 : i64} {
  func.func @lstm_fc_kernel(%arg0: memref<64x6xf32, #tpu.memory_space<vmem>>, %arg1: memref<64x4xf32, #tpu.memory_space<vmem>>, %arg2: memref<6x128xf32, #tpu.memory_space<vmem>>, %arg3: memref<4x128xf32, #tpu.memory_space<vmem>>, %arg4: memref<32x128xf32, #tpu.memory_space<vmem>>, %arg5: memref<1x128xf32, #tpu.memory_space<vmem>>, %arg6: memref<32x3xf32, #tpu.memory_space<vmem>>, %arg7: memref<1x3xf32, #tpu.memory_space<vmem>>, %arg8: memref<8x67xf32, #tpu.memory_space<vmem>>) attributes {dimension_semantics = [], scalar_prefetch = 0 : i64, scratch_operands = 0 : i64, tpu.core_type = #tpu.core_type<tc>} {
    %c0 = arith.constant 0 : index
    %c0_0 = arith.constant 0 : index
    %0 = vector.load %arg0[%c0, %c0_0] : memref<64x6xf32, #tpu.memory_space<vmem>>, vector<64x6xf32>
    %c0_1 = arith.constant 0 : index
    %c0_2 = arith.constant 0 : index
    %1 = vector.load %arg2[%c0_1, %c0_2] : memref<6x128xf32, #tpu.memory_space<vmem>>, vector<6x128xf32>
    %cst = arith.constant dense<0.000000e+00> : vector<64x128xf32>
    %2 = tpu.matmul %0, %1, %cst {dimension_numbers = #tpu.dot_dimension_numbers<[1], [0], [0], [1], [0, 0, 1, 1], [], []>} : vector<64x6xf32>, vector<6x128xf32>, vector<64x128xf32> -> vector<64x128xf32>
    %c0_3 = arith.constant 0 : index
    %c0_4 = arith.constant 0 : index
    %3 = vector.load %arg1[%c0_3, %c0_4] : memref<64x4xf32, #tpu.memory_space<vmem>>, vector<64x4xf32>
    %c0_5 = arith.constant 0 : index
    %c0_6 = arith.constant 0 : index
    %4 = vector.load %arg3[%c0_5, %c0_6] : memref<4x128xf32, #tpu.memory_space<vmem>>, vector<4x128xf32>
    %cst_7 = arith.constant dense<0.000000e+00> : vector<64x128xf32>
    %5 = tpu.matmul %3, %4, %cst_7 {dimension_numbers = #tpu.dot_dimension_numbers<[1], [0], [0], [1], [0, 0, 1, 1], [], []>} : vector<64x4xf32>, vector<4x128xf32>, vector<64x128xf32> -> vector<64x128xf32>
    %6 = arith.addf %2, %5 : vector<64x128xf32>
    %c0_8 = arith.constant 0 : index
    %c0_9 = arith.constant 0 : index
    %7 = vector.load %arg5[%c0_8, %c0_9] : memref<1x128xf32, #tpu.memory_space<vmem>>, vector<1x128xf32>
    %8 = vector.broadcast %7 : vector<1x128xf32> to vector<64x128xf32>
    %9 = arith.addf %6, %8 : vector<64x128xf32>
    %c0_10 = arith.constant 0 : index
    %c0_11 = arith.constant 0 : index
    %10 = vector.load %arg4[%c0_10, %c0_11] : memref<32x128xf32, #tpu.memory_space<vmem>>, vector<32x128xf32>
    %11 = tpu.iota {dimensions = array<i32: 1>} : vector<8x128xi32>
    %c64_i32 = arith.constant 64 : i32
    %12 = vector.broadcast %c64_i32 : i32 to vector<8x128xi32>
    %13 = arith.cmpi sge, %11, %12 : vector<8x128xi32>
    %c96_i32 = arith.constant 96 : i32
    %14 = vector.broadcast %c96_i32 : i32 to vector<8x128xi32>
    %15 = arith.cmpi slt, %11, %14 : vector<8x128xi32>
    %16 = arith.andi %13, %15 : vector<8x128xi1>
    %cst_12 = arith.constant 1.000000e+00 : f32
    %cst_13 = arith.constant 5.000000e-01 : f32
    %17 = vector.broadcast %cst_12 : f32 to vector<8x128xf32>
    %18 = vector.broadcast %cst_13 : f32 to vector<8x128xf32>
    %19 = arith.select %16, %17, %18 : vector<8x128xi1>, vector<8x128xf32>
    %cst_14 = arith.constant 0.000000e+00 : f32
    %cst_15 = arith.constant 5.000000e-01 : f32
    %20 = vector.broadcast %cst_14 : f32 to vector<8x128xf32>
    %21 = vector.broadcast %cst_15 : f32 to vector<8x128xf32>
    %22 = arith.select %16, %20, %21 : vector<8x128xi1>, vector<8x128xf32>
    %cst_16 = arith.constant 0.000000e+00 : f32
    %23 = vector.broadcast %cst_16 : f32 to vector<8x32xf32>
    %cst_17 = arith.constant 0.000000e+00 : f32
    %24 = vector.broadcast %cst_17 : f32 to vector<8x32xf32>
    %25 = vector.extract_strided_slice %9 {offsets = [0, 0], sizes = [8, 128], strides = [1, 1]} : vector<64x128xf32> to vector<8x128xf32>
    %cst_18 = arith.constant dense<0.000000e+00> : vector<8x128xf32>
    %26 = tpu.matmul %23, %10, %cst_18 {dimension_numbers = #tpu.dot_dimension_numbers<[1], [0], [0], [1], [0, 0, 1, 1], [], []>} : vector<8x32xf32>, vector<32x128xf32>, vector<8x128xf32> -> vector<8x128xf32>
    %27 = arith.addf %25, %26 : vector<8x128xf32>
    %28 = math.tanh %27 : vector<8x128xf32>
    %29 = arith.mulf %19, %28 : vector<8x128xf32>
    %30 = arith.addf %29, %22 : vector<8x128xf32>
    %31 = vector.extract_strided_slice %30 {offsets = [0, 0], sizes = [8, 32], strides = [1, 1]} : vector<8x128xf32> to vector<8x32xf32>
    %32 = vector.extract_strided_slice %30 {offsets = [0, 32], sizes = [8, 32], strides = [1, 1]} : vector<8x128xf32> to vector<8x32xf32>
    %33 = vector.extract_strided_slice %30 {offsets = [0, 64], sizes = [8, 32], strides = [1, 1]} : vector<8x128xf32> to vector<8x32xf32>
    %34 = vector.extract_strided_slice %30 {offsets = [0, 96], sizes = [8, 32], strides = [1, 1]} : vector<8x128xf32> to vector<8x32xf32>
    %35 = arith.mulf %32, %24 : vector<8x32xf32>
    %36 = arith.mulf %31, %33 : vector<8x32xf32>
    %37 = arith.addf %35, %36 : vector<8x32xf32>
    %38 = math.tanh %37 : vector<8x32xf32>
    %39 = arith.mulf %34, %38 : vector<8x32xf32>
    %40 = vector.extract_strided_slice %9 {offsets = [8, 0], sizes = [8, 128], strides = [1, 1]} : vector<64x128xf32> to vector<8x128xf32>
    %cst_19 = arith.constant dense<0.000000e+00> : vector<8x128xf32>
    %41 = tpu.matmul %39, %10, %cst_19 {dimension_numbers = #tpu.dot_dimension_numbers<[1], [0], [0], [1], [0, 0, 1, 1], [], []>} : vector<8x32xf32>, vector<32x128xf32>, vector<8x128xf32> -> vector<8x128xf32>
    %42 = arith.addf %40, %41 : vector<8x128xf32>
    %43 = math.tanh %42 : vector<8x128xf32>
    %44 = arith.mulf %19, %43 : vector<8x128xf32>
    %45 = arith.addf %44, %22 : vector<8x128xf32>
    %46 = vector.extract_strided_slice %45 {offsets = [0, 0], sizes = [8, 32], strides = [1, 1]} : vector<8x128xf32> to vector<8x32xf32>
    %47 = vector.extract_strided_slice %45 {offsets = [0, 32], sizes = [8, 32], strides = [1, 1]} : vector<8x128xf32> to vector<8x32xf32>
    %48 = vector.extract_strided_slice %45 {offsets = [0, 64], sizes = [8, 32], strides = [1, 1]} : vector<8x128xf32> to vector<8x32xf32>
    %49 = vector.extract_strided_slice %45 {offsets = [0, 96], sizes = [8, 32], strides = [1, 1]} : vector<8x128xf32> to vector<8x32xf32>
    %50 = arith.mulf %47, %37 : vector<8x32xf32>
    %51 = arith.mulf %46, %48 : vector<8x32xf32>
    %52 = arith.addf %50, %51 : vector<8x32xf32>
    %53 = math.tanh %52 : vector<8x32xf32>
    %54 = arith.mulf %49, %53 : vector<8x32xf32>
    %55 = vector.extract_strided_slice %9 {offsets = [16, 0], sizes = [8, 128], strides = [1, 1]} : vector<64x128xf32> to vector<8x128xf32>
    %cst_20 = arith.constant dense<0.000000e+00> : vector<8x128xf32>
    %56 = tpu.matmul %54, %10, %cst_20 {dimension_numbers = #tpu.dot_dimension_numbers<[1], [0], [0], [1], [0, 0, 1, 1], [], []>} : vector<8x32xf32>, vector<32x128xf32>, vector<8x128xf32> -> vector<8x128xf32>
    %57 = arith.addf %55, %56 : vector<8x128xf32>
    %58 = math.tanh %57 : vector<8x128xf32>
    %59 = arith.mulf %19, %58 : vector<8x128xf32>
    %60 = arith.addf %59, %22 : vector<8x128xf32>
    %61 = vector.extract_strided_slice %60 {offsets = [0, 0], sizes = [8, 32], strides = [1, 1]} : vector<8x128xf32> to vector<8x32xf32>
    %62 = vector.extract_strided_slice %60 {offsets = [0, 32], sizes = [8, 32], strides = [1, 1]} : vector<8x128xf32> to vector<8x32xf32>
    %63 = vector.extract_strided_slice %60 {offsets = [0, 64], sizes = [8, 32], strides = [1, 1]} : vector<8x128xf32> to vector<8x32xf32>
    %64 = vector.extract_strided_slice %60 {offsets = [0, 96], sizes = [8, 32], strides = [1, 1]} : vector<8x128xf32> to vector<8x32xf32>
    %65 = arith.mulf %62, %52 : vector<8x32xf32>
    %66 = arith.mulf %61, %63 : vector<8x32xf32>
    %67 = arith.addf %65, %66 : vector<8x32xf32>
    %68 = math.tanh %67 : vector<8x32xf32>
    %69 = arith.mulf %64, %68 : vector<8x32xf32>
    %70 = vector.extract_strided_slice %9 {offsets = [24, 0], sizes = [8, 128], strides = [1, 1]} : vector<64x128xf32> to vector<8x128xf32>
    %cst_21 = arith.constant dense<0.000000e+00> : vector<8x128xf32>
    %71 = tpu.matmul %69, %10, %cst_21 {dimension_numbers = #tpu.dot_dimension_numbers<[1], [0], [0], [1], [0, 0, 1, 1], [], []>} : vector<8x32xf32>, vector<32x128xf32>, vector<8x128xf32> -> vector<8x128xf32>
    %72 = arith.addf %70, %71 : vector<8x128xf32>
    %73 = math.tanh %72 : vector<8x128xf32>
    %74 = arith.mulf %19, %73 : vector<8x128xf32>
    %75 = arith.addf %74, %22 : vector<8x128xf32>
    %76 = vector.extract_strided_slice %75 {offsets = [0, 0], sizes = [8, 32], strides = [1, 1]} : vector<8x128xf32> to vector<8x32xf32>
    %77 = vector.extract_strided_slice %75 {offsets = [0, 32], sizes = [8, 32], strides = [1, 1]} : vector<8x128xf32> to vector<8x32xf32>
    %78 = vector.extract_strided_slice %75 {offsets = [0, 64], sizes = [8, 32], strides = [1, 1]} : vector<8x128xf32> to vector<8x32xf32>
    %79 = vector.extract_strided_slice %75 {offsets = [0, 96], sizes = [8, 32], strides = [1, 1]} : vector<8x128xf32> to vector<8x32xf32>
    %80 = arith.mulf %77, %67 : vector<8x32xf32>
    %81 = arith.mulf %76, %78 : vector<8x32xf32>
    %82 = arith.addf %80, %81 : vector<8x32xf32>
    %83 = math.tanh %82 : vector<8x32xf32>
    %84 = arith.mulf %79, %83 : vector<8x32xf32>
    %85 = vector.extract_strided_slice %9 {offsets = [32, 0], sizes = [8, 128], strides = [1, 1]} : vector<64x128xf32> to vector<8x128xf32>
    %cst_22 = arith.constant dense<0.000000e+00> : vector<8x128xf32>
    %86 = tpu.matmul %84, %10, %cst_22 {dimension_numbers = #tpu.dot_dimension_numbers<[1], [0], [0], [1], [0, 0, 1, 1], [], []>} : vector<8x32xf32>, vector<32x128xf32>, vector<8x128xf32> -> vector<8x128xf32>
    %87 = arith.addf %85, %86 : vector<8x128xf32>
    %88 = math.tanh %87 : vector<8x128xf32>
    %89 = arith.mulf %19, %88 : vector<8x128xf32>
    %90 = arith.addf %89, %22 : vector<8x128xf32>
    %91 = vector.extract_strided_slice %90 {offsets = [0, 0], sizes = [8, 32], strides = [1, 1]} : vector<8x128xf32> to vector<8x32xf32>
    %92 = vector.extract_strided_slice %90 {offsets = [0, 32], sizes = [8, 32], strides = [1, 1]} : vector<8x128xf32> to vector<8x32xf32>
    %93 = vector.extract_strided_slice %90 {offsets = [0, 64], sizes = [8, 32], strides = [1, 1]} : vector<8x128xf32> to vector<8x32xf32>
    %94 = vector.extract_strided_slice %90 {offsets = [0, 96], sizes = [8, 32], strides = [1, 1]} : vector<8x128xf32> to vector<8x32xf32>
    %95 = arith.mulf %92, %82 : vector<8x32xf32>
    %96 = arith.mulf %91, %93 : vector<8x32xf32>
    %97 = arith.addf %95, %96 : vector<8x32xf32>
    %98 = math.tanh %97 : vector<8x32xf32>
    %99 = arith.mulf %94, %98 : vector<8x32xf32>
    %100 = vector.extract_strided_slice %9 {offsets = [40, 0], sizes = [8, 128], strides = [1, 1]} : vector<64x128xf32> to vector<8x128xf32>
    %cst_23 = arith.constant dense<0.000000e+00> : vector<8x128xf32>
    %101 = tpu.matmul %99, %10, %cst_23 {dimension_numbers = #tpu.dot_dimension_numbers<[1], [0], [0], [1], [0, 0, 1, 1], [], []>} : vector<8x32xf32>, vector<32x128xf32>, vector<8x128xf32> -> vector<8x128xf32>
    %102 = arith.addf %100, %101 : vector<8x128xf32>
    %103 = math.tanh %102 : vector<8x128xf32>
    %104 = arith.mulf %19, %103 : vector<8x128xf32>
    %105 = arith.addf %104, %22 : vector<8x128xf32>
    %106 = vector.extract_strided_slice %105 {offsets = [0, 0], sizes = [8, 32], strides = [1, 1]} : vector<8x128xf32> to vector<8x32xf32>
    %107 = vector.extract_strided_slice %105 {offsets = [0, 32], sizes = [8, 32], strides = [1, 1]} : vector<8x128xf32> to vector<8x32xf32>
    %108 = vector.extract_strided_slice %105 {offsets = [0, 64], sizes = [8, 32], strides = [1, 1]} : vector<8x128xf32> to vector<8x32xf32>
    %109 = vector.extract_strided_slice %105 {offsets = [0, 96], sizes = [8, 32], strides = [1, 1]} : vector<8x128xf32> to vector<8x32xf32>
    %110 = arith.mulf %107, %97 : vector<8x32xf32>
    %111 = arith.mulf %106, %108 : vector<8x32xf32>
    %112 = arith.addf %110, %111 : vector<8x32xf32>
    %113 = math.tanh %112 : vector<8x32xf32>
    %114 = arith.mulf %109, %113 : vector<8x32xf32>
    %115 = vector.extract_strided_slice %9 {offsets = [48, 0], sizes = [8, 128], strides = [1, 1]} : vector<64x128xf32> to vector<8x128xf32>
    %cst_24 = arith.constant dense<0.000000e+00> : vector<8x128xf32>
    %116 = tpu.matmul %114, %10, %cst_24 {dimension_numbers = #tpu.dot_dimension_numbers<[1], [0], [0], [1], [0, 0, 1, 1], [], []>} : vector<8x32xf32>, vector<32x128xf32>, vector<8x128xf32> -> vector<8x128xf32>
    %117 = arith.addf %115, %116 : vector<8x128xf32>
    %118 = math.tanh %117 : vector<8x128xf32>
    %119 = arith.mulf %19, %118 : vector<8x128xf32>
    %120 = arith.addf %119, %22 : vector<8x128xf32>
    %121 = vector.extract_strided_slice %120 {offsets = [0, 0], sizes = [8, 32], strides = [1, 1]} : vector<8x128xf32> to vector<8x32xf32>
    %122 = vector.extract_strided_slice %120 {offsets = [0, 32], sizes = [8, 32], strides = [1, 1]} : vector<8x128xf32> to vector<8x32xf32>
    %123 = vector.extract_strided_slice %120 {offsets = [0, 64], sizes = [8, 32], strides = [1, 1]} : vector<8x128xf32> to vector<8x32xf32>
    %124 = vector.extract_strided_slice %120 {offsets = [0, 96], sizes = [8, 32], strides = [1, 1]} : vector<8x128xf32> to vector<8x32xf32>
    %125 = arith.mulf %122, %112 : vector<8x32xf32>
    %126 = arith.mulf %121, %123 : vector<8x32xf32>
    %127 = arith.addf %125, %126 : vector<8x32xf32>
    %128 = math.tanh %127 : vector<8x32xf32>
    %129 = arith.mulf %124, %128 : vector<8x32xf32>
    %130 = vector.extract_strided_slice %9 {offsets = [56, 0], sizes = [8, 128], strides = [1, 1]} : vector<64x128xf32> to vector<8x128xf32>
    %cst_25 = arith.constant dense<0.000000e+00> : vector<8x128xf32>
    %131 = tpu.matmul %129, %10, %cst_25 {dimension_numbers = #tpu.dot_dimension_numbers<[1], [0], [0], [1], [0, 0, 1, 1], [], []>} : vector<8x32xf32>, vector<32x128xf32>, vector<8x128xf32> -> vector<8x128xf32>
    %132 = arith.addf %130, %131 : vector<8x128xf32>
    %133 = math.tanh %132 : vector<8x128xf32>
    %134 = arith.mulf %19, %133 : vector<8x128xf32>
    %135 = arith.addf %134, %22 : vector<8x128xf32>
    %136 = vector.extract_strided_slice %135 {offsets = [0, 0], sizes = [8, 32], strides = [1, 1]} : vector<8x128xf32> to vector<8x32xf32>
    %137 = vector.extract_strided_slice %135 {offsets = [0, 32], sizes = [8, 32], strides = [1, 1]} : vector<8x128xf32> to vector<8x32xf32>
    %138 = vector.extract_strided_slice %135 {offsets = [0, 64], sizes = [8, 32], strides = [1, 1]} : vector<8x128xf32> to vector<8x32xf32>
    %139 = vector.extract_strided_slice %135 {offsets = [0, 96], sizes = [8, 32], strides = [1, 1]} : vector<8x128xf32> to vector<8x32xf32>
    %140 = arith.mulf %137, %127 : vector<8x32xf32>
    %141 = arith.mulf %136, %138 : vector<8x32xf32>
    %142 = arith.addf %140, %141 : vector<8x32xf32>
    %143 = math.tanh %142 : vector<8x32xf32>
    %144 = arith.mulf %139, %143 : vector<8x32xf32>
    %c0_26 = arith.constant 0 : index
    %c0_27 = arith.constant 0 : index
    %145 = vector.load %arg8[%c0_26, %c0_27] : memref<8x67xf32, #tpu.memory_space<vmem>>, vector<8x32xf32>
    tpu.vector_store %arg8[%c0_26, %c0_27], %144 {strides = array<i32>} : memref<8x67xf32, #tpu.memory_space<vmem>>, vector<8x32xf32>,
    %c0_28 = arith.constant 0 : index
    %c32 = arith.constant 32 : index
    %146 = vector.load %arg8[%c0_28, %c32] : memref<8x67xf32, #tpu.memory_space<vmem>>, vector<8x32xf32>
    tpu.vector_store %arg8[%c0_28, %c32], %142 {strides = array<i32>} : memref<8x67xf32, #tpu.memory_space<vmem>>, vector<8x32xf32>,
    %c0_29 = arith.constant 0 : index
    %c0_30 = arith.constant 0 : index
    %147 = vector.load %arg6[%c0_29, %c0_30] : memref<32x3xf32, #tpu.memory_space<vmem>>, vector<32x3xf32>
    %cst_31 = arith.constant dense<0.000000e+00> : vector<8x3xf32>
    %148 = tpu.matmul %144, %147, %cst_31 {dimension_numbers = #tpu.dot_dimension_numbers<[1], [0], [0], [1], [0, 0, 1, 1], [], []>} : vector<8x32xf32>, vector<32x3xf32>, vector<8x3xf32> -> vector<8x3xf32>
    %c0_32 = arith.constant 0 : index
    %c0_33 = arith.constant 0 : index
    %149 = vector.load %arg7[%c0_32, %c0_33] : memref<1x3xf32, #tpu.memory_space<vmem>>, vector<1x3xf32>
    %150 = vector.broadcast %149 : vector<1x3xf32> to vector<8x3xf32>
    %151 = arith.addf %148, %150 : vector<8x3xf32>
    %c0_34 = arith.constant 0 : index
    %c64 = arith.constant 64 : index
    %152 = vector.load %arg8[%c0_34, %c64] : memref<8x67xf32, #tpu.memory_space<vmem>>, vector<8x3xf32>
    tpu.vector_store %arg8[%c0_34, %c64], %151 {strides = array<i32>} : memref<8x67xf32, #tpu.memory_space<vmem>>, vector<8x3xf32>,
    return
  }
}

</mosaic_0001>

<bundles_post_ra>
// kernel: _lambda_.1
= control target key start
LH: loop header
LB: loop body
LE: loop exit
PB: predicated region body
PF: predicated region fallthrough
CT: control target
= control target key end

     0   :  { %vm72_vm0 = vcmask 1043456   ;;  %vm47_vm1 = vcmask 31744   ;;  %vm206_vm2 = vcmask 1045504   ;;  %v1526_v3 = vmov 0.0|0.0   ;;  %s1825_s3 = inlined_call_operand.vmem [shape: f32[4,128], index: 3, kind: input, shape index: {}]   ;;  %s1826_s1 = inlined_call_operand.vmem [shape: f32[64,4], index: 1, kind: input, shape index: {}]   ;;  %s1827_s2 = inlined_call_operand.vmem [shape: f32[6,128], index: 2, kind: input, shape index: {}]   ;;  %s1828_s4 = inlined_call_operand.vmem [shape: f32[32,128], index: 4, kind: input, shape index: {}]   ;;  %s1829_s0 = inlined_call_operand.vmem [shape: f32[64,6], index: 0, kind: input, shape index: {}]   ;;  %s1830_s5 = inlined_call_operand.vmem [shape: f32[1,128], index: 5, kind: input, shape index: {}]   ;;  %s1831_s6 = inlined_call_operand.vmem [shape: f32[32,3], index: 6, kind: input, shape index: {}]   ;;  %s1832_s8 = inlined_call_operand.vmem [shape: f32[8,67], index: 8, kind: output, shape index: {}]   ;;  %s1833_s7 = inlined_call_operand.vmem [shape: f32[1,3], index: 7, kind: input, shape index: {}]  }
   0x1   :  { %v46_v0 = vld [vmem:[%s1825_s3] sm:$0xf]  ;;  %v39_v2 = vld [vmem:[%s1826_s1 + $0x8] sm:$0xff]  ;;  %1426 = vmatprep.subr.bf16.mxu1 %v1526_v3  ;;  %v40_v5 = vld [vmem:[%s1826_s1 + $0x10] sm:$0xff]  ;;  %vm1527_vm3 = vmmov 0   ;;  %v1528_v6 = vmov 0.0   ;;  %v334_v30 = vlaneseq }
   0x2   :  { %v38_v1 = vld [vmem:[%s1826_s1] sm:$0xff]  ;;  %1299 = vmatprep.subr.msk.mxu0 %vm72_vm0, %v46_v0  ;;  %1335 = vmatprep.mubr.msk.f32.mxu1 %vm1527_vm3, %v1528_v6  ;;  %v331_v8 = vld [vmem:[%s1828_s4 + $0x8] sm:$0xff]  ;;  %v41_v9 = vld [vmem:[%s1826_s1 + $0x18] sm:$0xff]  ;;  %vm181_vm4 = vcmask 48128   ;;  %v1529_v48 = vmov 0.5   ;;  %vm341_vm8 = vcmask 261120  }
   0x3   :  { %1301 = vmatprep.mubr.msk.f32.mxu0 %vm47_vm1, %v38_v1  ;;  %v37_v4 = vld [vmem:[%s1827_s2] sm:$0x3f]  ;;  %1300 = vmatpush3.msk.msra.mxu0 %vm72_vm0, %v46_v0  ;;  %v332_v11 = vld [vmem:[%s1828_s4 + $0x10] sm:$0xff]  ;;  %v333_v13 = vld [vmem:[%s1828_s4 + $0x18] sm:$0xff]  ;;  %v335_v36 = vand.u32 127, %v334_v30  ;;  %vm1113_vm9 = vcmask 523520  }
   0x4   :  { %1302 = vmatmul.mubr.msk.f32.vlgmr.msra.gmra.mrb[0].mxu0 %vm47_vm1, %v39_v2  ;;  %1313 = vmatprep.subr.msk.mxu0 %vm206_vm2, %v37_v4  ;;  %v330_v7 = vld [vmem:[%s1828_s4] sm:$0xff]  ;;  %v1622_v14 = vpack.c.bf16 %v333_v13, %v332_v11  ;;  %v43_v15 = vld [vmem:[%s1826_s1 + $0x28] sm:$0xff]  ;;  %v44_v16 = vld [vmem:[%s1826_s1 + $0x30] sm:$0xff]  ;;  %vm1202_vm10 = vcmask 548352  }
   0x5   :  { %1314 = vmatpush3.msk.msra.mxu0 %vm206_vm2, %v37_v4  ;;  %1304 = vmatprep.mubr.msk.f32.mxu0 %vm47_vm1, %v40_v5  ;;  %v1609_v10 = vpack.c.bf16 %v331_v8, %v330_v7  ;;  %v42_v12 = vld [vmem:[%s1826_s1 + $0x20] sm:$0xff]  ;;  %v45_v17 = vld [vmem:[%s1826_s1 + $0x38] sm:$0xff]  ;;  %v30_v19 = vld [vmem:[%s1829_s0 + $0x8] sm:$0xff]  ;;  %vm336_vm5 = vcmp.ge.s32.totalorder %v335_v36, 64  ;;  %vm337_vm6 = vcmp.lt.s32.totalorder %v335_v36, 96 }
   0x6   :  { %1450 = vmatprep.subr.bf16.mxu0 %v1526_v3  ;;  %v29_v18 = vld [vmem:[%s1829_s0] sm:$0xff]  ;;  %v31_v20 = vld [vmem:[%s1829_s0 + $0x10] sm:$0xff]  ;;  %v32_v21 = vld [vmem:[%s1829_s0 + $0x18] sm:$0xff] }
   0x7   :  { %1428 = vmatpush3.bf16.msra.mxu1 %v1609_v10  ;;  %v33_v22 = vld [vmem:[%s1829_s0 + $0x20] sm:$0xff]  ;;  %v34_v23 = vld [vmem:[%s1829_s0 + $0x28] sm:$0xff]  ;;  %v35_v24 = vld [vmem:[%s1829_s0 + $0x30] sm:$0xff] }
   0x8   :  { %1305 = vmatmul.mubr.msk.f32.gmra.mrb[2].mxu0 %vm47_vm1, %v41_v9  ;;  %1429 = vmatprep.subr.bf16.mxu1 %v1526_v3  ;;  %v36_v25 = vld [vmem:[%s1829_s0 + $0x38] sm:$0xff]  ;;  %v1226_v28 = vld [vmem:[%s1830_s5] ss:$0 sm:$0xff]  ;;  %vm338_vm7 = vmand %vm336_vm5, %vm337_vm6  ;;  %s1530_s0 = smov 64   ;;  %s1531_s5 = smov 32  }
   0x9   :  { %1307 = vmatprep.mubr.msk.f32.mxu0 %vm47_vm1, %v42_v12  ;;  %v1701_v49 = vsel %vm338_vm7, 1.0, %v1529_v48  ;;  %v1703_v51 = vsel %vm338_vm7, 0.0, %v1529_v48 }
   0xb   :  { %1431 = vmatpush3.bf16.msra.mxu1 %v1622_v14 }
   0xc   :  { %1308 = vmatmul.mubr.msk.f32.gmra.mrb[4].mxu0 %vm47_vm1, %v43_v15  ;;  %1432 = vmatprep.subr.bf16.mxu1 %v1526_v3 }
   0xd   :  { %1310 = vmatprep.mubr.msk.f32.mxu0 %vm47_vm1, %v44_v16 }
   0xe   :  { %1336 = vmatmul.mubr.f32.vlgmr.msra.gmra.mrb[0].mxu1 %v1528_v6 }
   0xf   :  { %1434 = vmatpush3.bf16.msra.mxu1 %v1609_v10  ;;  %1346 = vmatprep.mubr.msk.f32.mxu1 %vm1527_vm3, %v1528_v6 }
  0x10   :  { %1311 = vmatmul.mubr.msk.f32.gmra.mrb[6].mxu0 %vm47_vm1, %v45_v17  ;;  %1435 = vmatprep.subr.bf16.mxu1 %v1526_v3 }
  0x11   :  { %1315 = vmatprep.mubr.msk.f32.mxu0 %vm181_vm4, %v29_v18 }
  0x13   :  { %1437 = vmatpush3.bf16.msra.mxu1 %v1622_v14 }
  0x14   :  { %1316 = vmatmul.mubr.msk.f32.vlgmr.msra.gmra.mrb[0].mxu0 %vm181_vm4, %v30_v19  ;;  %1438 = vmatprep.subr.bf16.mxu1 %v1526_v3 }
  0x15   :  { %1318 = vmatprep.mubr.msk.f32.mxu0 %vm181_vm4, %v31_v20  ;;  %1452 = vmatpush3.bf16.msra.mxu0 %v1609_v10 }
  0x16   :  { %1453 = vmatprep.subr.bf16.mxu0 %v1526_v3 }
  0x18   :  { %1319 = vmatmul.mubr.msk.f32.gmra.mrb[2].mxu0 %vm181_vm4, %v32_v21 }
  0x19   :  { %1321 = vmatprep.mubr.msk.f32.mxu0 %vm181_vm4, %v33_v22  ;;  %1455 = vmatpush3.bf16.msra.mxu0 %v1622_v14 }
  0x1a   :  { %1462 = vmatprep.subr.bf16.mxu0 %v1526_v3 }
  0x1c   :  { %1322 = vmatmul.mubr.msk.f32.gmra.mrb[4].mxu0 %vm181_vm4, %v34_v23 }
  0x1d   :  { %1324 = vmatprep.mubr.msk.f32.mxu0 %vm181_vm4, %v35_v24 }
  0x20   :  { %1325 = vmatmul.mubr.msk.f32.gmra.mrb[6].mxu0 %vm181_vm4, %v36_v25 }
  0x21   :  { %1379 = vmatprep.mubr.msk.f32.mxu0 %vm1527_vm3, %v1528_v6 }
  0xe1   :  { %v411_v26 = vpop.f32.mrb[0].mxu1 }
  0xe2   :  { %v1337_v27 = vpop.f32.mrb[1].mxu1 }
  0xe7   :  { %v1317_v29 = vpop.f32.mrb[0].mxu0 }
  0xe8   :  { %v323_v31 = vadd.f32 %v1317_v29, %v1226_v28  ;;  %v276_v32 = vpop.f32.mrb[1].mxu0 }
  0xe9   :  { %v322_v33 = vadd.f32 %v1226_v28, %v276_v32 }
  0xeb   :  { %v415_v34 = vadd.f32 %v411_v26, %v322_v33  ;;  %v1320_v35 = vpop.f32.mrb[2].mxu0 }
  0xec   :  { %v1689_v37 = vadd.f32 %v1320_v35, %v1226_v28  ;;  %v286_v38 = vpop.f32.mrb[3].mxu0 }
  0xed   :  { %1494 = vtanh.f32 %v415_v34  ;;  %v1691_v39 = vadd.f32 %v1226_v28, %v286_v38 }
  0xef   :  { %v1323_v40 = vpop.f32.mrb[4].mxu0 }
  0xf0   :  { %v1693_v41 = vadd.f32 %v1323_v40, %v1226_v28  ;;  %v296_v42 = vpop.f32.mrb[5].mxu0 }
  0xf1   :  { %v1695_v43 = vadd.f32 %v1226_v28, %v296_v42 }
  0xf3   :  { %v1326_v44 = vpop.f32.mrb[6].mxu0 }
  0xf4   :  { %v1697_v45 = vadd.f32 %v1326_v44, %v1226_v28  ;;  %v306_v46 = vpop.f32.mrb[7].mxu0 }
  0xf5   :  { %v1699_v47 = vadd.f32 %v1226_v28, %v306_v46 }
  0xf7   :  { %v1495_v50 = vpop.eup %1494 }
  0xf8   :  { %v417_v52 = vmul.f32 %v1495_v50, %v1701_v49 }
  0xfa   :  { %v418_v53 = vadd.f32 %v417_v52, %v1703_v51 }
  0xfc   :  { %421 = vrot.lane.b32.xlu0 %v418_v53, %s1530_s0  ;;  %v419_v56 = vmul.f32 0.0, %v418_v53 }
 0x16e   :  { %v422_v54 = vpop.permute.xlu0 %421 }
 0x16f   :  { %v424_v55 = vmul.f32 %v422_v54, %v418_v53 }
 0x171   :  { %426 = vrot.lane.b32.xlu0 %v424_v55, %s1531_s5 }
 0x1e3   :  { %v427_v57 = vpop.permute.xlu0 %426 }
 0x1e4   :  { %v429_v58 = vadd.f32 %v427_v57, %v419_v56 }
 0x1e6   :  { %1496 = vtanh.f32 %v429_v58 }
 0x1f0   :  { %v1497_v59 = vpop.eup %1496 }
 0x1f1   :  { %432 = vrot.lane.b32.xlu1 %v1497_v59, %s1530_s0 }
 0x263   :  { %v433_v60 = vpop.permute.xlu1 %432 }
 0x264   :  { %v435_v61 = vmul.f32 %v433_v60, %v418_v53 }
 0x266   :  { %437 = vrot.lane.b32.xlu1 %v435_v61, %s1531_s5 }
 0x2d8   :  { %v438_v62 = vpop.permute.xlu1 %437 }
 0x2d9   :  { %1347 = vmatmul.mubr.msk.f32.vlgmr.msra.gmra.mrb[2].mxu1 %vm341_vm8, %v438_v62 }
 0x2da   :  { %1440 = vmatpush3.bf16.msra.mxu1 %v1609_v10  ;;  %1357 = vmatprep.mubr.msk.f32.mxu1 %vm1527_vm3, %v1528_v6 }
 0x2db   :  { %1441 = vmatprep.subr.bf16.mxu1 %v1526_v3 }
 0x2de   :  { %1443 = vmatpush3.bf16.msra.mxu1 %v1622_v14 }
 0x2df   :  { %1444 = vmatprep.subr.bf16.mxu1 %v1526_v3 }
 0x3ac   :  { %v507_v63 = vpop.f32.mrb[2].mxu1 }
 0x3ad   :  { %v511_v0 = vadd.f32 %v507_v63, %v323_v31  ;;  %v1348_v1 = vpop.f32.mrb[3].mxu1 }
 0x3af   :  { %1498 = vtanh.f32 %v511_v0 }
 0x3b9   :  { %v1499_v2 = vpop.eup %1498 }
 0x3ba   :  { %v513_v4 = vmul.f32 %v1499_v2, %v1701_v49 }
 0x3bc   :  { %v514_v5 = vadd.f32 %v513_v4, %v1703_v51 }
 0x3be   :  { %517 = vrot.lane.b32.xlu0 %v514_v5, %s1530_s0  ;;  %v515_v9 = vmul.f32 %v514_v5, %v429_v58 }
 0x430   :  { %v518_v7 = vpop.permute.xlu0 %517 }
 0x431   :  { %v520_v8 = vmul.f32 %v518_v7, %v514_v5 }
 0x433   :  { %522 = vrot.lane.b32.xlu1 %v520_v8, %s1531_s5 }
 0x4a5   :  { %v523_v11 = vpop.permute.xlu1 %522 }
 0x4a6   :  { %v525_v12 = vadd.f32 %v523_v11, %v515_v9 }
 0x4a8   :  { %1500 = vtanh.f32 %v525_v12 }
 0x4b2   :  { %v1501_v13 = vpop.eup %1500 }
 0x4b3   :  { %528 = vrot.lane.b32.xlu0 %v1501_v13, %s1530_s0 }
 0x525   :  { %v529_v15 = vpop.permute.xlu0 %528 }
 0x526   :  { %v531_v16 = vmul.f32 %v529_v15, %v514_v5 }
 0x528   :  { %533 = vrot.lane.b32.xlu1 %v531_v16, %s1531_s5 }
 0x59a   :  { %v534_v17 = vpop.permute.xlu1 %533 }
 0x59b   :  { %1358 = vmatmul.mubr.msk.f32.vlgmr.msra.gmra.mrb[4].mxu1 %vm341_vm8, %v534_v17 }
 0x59c   :  { %1446 = vmatpush3.bf16.msra.mxu1 %v1609_v10  ;;  %1368 = vmatprep.mubr.msk.f32.mxu1 %vm1527_vm3, %v1528_v6 }
 0x59d   :  { %1447 = vmatprep.subr.bf16.mxu1 %v1526_v3 }
 0x5a0   :  { %1449 = vmatpush3.bf16.msra.mxu1 %v1622_v14 }
 0x5a1   :  { %1456 = vmatprep.subr.bf16.mxu1 %v1526_v3 }
 0x66e   :  { %v603_v18 = vpop.f32.mrb[4].mxu1 }
 0x66f   :  { %v607_v19 = vadd.f32 %v603_v18, %v1691_v39  ;;  %v1359_v20 = vpop.f32.mrb[5].mxu1 }
 0x671   :  { %1502 = vtanh.f32 %v607_v19 }
 0x67b   :  { %v1503_v21 = vpop.eup %1502 }
 0x67c   :  { %v609_v22 = vmul.f32 %v1503_v21, %v1701_v49 }
 0x67e   :  { %v610_v23 = vadd.f32 %v609_v22, %v1703_v51 }
 0x680   :  { %613 = vrot.lane.b32.xlu0 %v610_v23, %s1530_s0  ;;  %v611_v26 = vmul.f32 %v610_v23, %v525_v12 }
 0x6f2   :  { %v614_v24 = vpop.permute.xlu0 %613 }
 0x6f3   :  { %v616_v25 = vmul.f32 %v614_v24, %v610_v23 }
 0x6f5   :  { %618 = vrot.lane.b32.xlu1 %v616_v25, %s1531_s5 }
 0x767   :  { %v619_v27 = vpop.permute.xlu1 %618 }
 0x768   :  { %v621_v28 = vadd.f32 %v619_v27, %v611_v26 }
 0x76a   :  { %1504 = vtanh.f32 %v621_v28 }
 0x774   :  { %v1505_v29 = vpop.eup %1504 }
 0x775   :  { %624 = vrot.lane.b32.xlu0 %v1505_v29, %s1530_s0 }
 0x7e7   :  { %v625_v30 = vpop.permute.xlu0 %624 }
 0x7e8   :  { %v627_v31 = vmul.f32 %v625_v30, %v610_v23 }
 0x7ea   :  { %629 = vrot.lane.b32.xlu1 %v627_v31, %s1531_s5 }
 0x85c   :  { %v630_v32 = vpop.permute.xlu1 %629 }
 0x85d   :  { %1369 = vmatmul.mubr.msk.f32.vlgmr.msra.gmra.mrb[6].mxu1 %vm341_vm8, %v630_v32 }
 0x85e   :  { %1458 = vmatpush3.bf16.msra.mxu1 %v1609_v10  ;;  %1390 = vmatprep.mubr.msk.f32.mxu1 %vm1527_vm3, %v1528_v6 }
 0x85f   :  { %1459 = vmatprep.subr.bf16.mxu1 %v1526_v3 }
 0x862   :  { %1461 = vmatpush3.bf16.msra.mxu1 %v1622_v14 }
 0x863   :  { %1468 = vmatprep.subr.bf16.mxu1 %v1526_v3 }
 0x930   :  { %v699_v33 = vpop.f32.mrb[6].mxu1 }
 0x931   :  { %v703_v34 = vadd.f32 %v699_v33, %v1689_v37  ;;  %v1370_v35 = vpop.f32.mrb[7].mxu1 }
 0x933   :  { %1506 = vtanh.f32 %v703_v34 }
 0x93d   :  { %v1507_v36 = vpop.eup %1506 }
 0x93e   :  { %v705_v38 = vmul.f32 %v1507_v36, %v1701_v49 }
 0x940   :  { %v706_v39 = vadd.f32 %v705_v38, %v1703_v51 }
 0x942   :  { %709 = vrot.lane.b32.xlu0 %v706_v39, %s1530_s0  ;;  %v707_v44 = vmul.f32 %v706_v39, %v621_v28 }
 0x9b4   :  { %v710_v40 = vpop.permute.xlu0 %709 }
 0x9b5   :  { %v712_v42 = vmul.f32 %v710_v40, %v706_v39 }
 0x9b7   :  { %714 = vrot.lane.b32.xlu1 %v712_v42, %s1531_s5 }
 0xa29   :  { %v715_v46 = vpop.permute.xlu1 %714 }
 0xa2a   :  { %v717_v48 = vadd.f32 %v715_v46, %v707_v44 }
 0xa2c   :  { %1508 = vtanh.f32 %v717_v48 }
 0xa36   :  { %v1509_v50 = vpop.eup %1508 }
 0xa37   :  { %720 = vrot.lane.b32.xlu0 %v1509_v50, %s1530_s0 }
 0xaa9   :  { %v721_v37 = vpop.permute.xlu0 %720 }
 0xaaa   :  { %v723_v52 = vmul.f32 %v721_v37, %v706_v39  ;;  %v1118_v37 = vld [vmem:[%s1831_s6 + $0x18] sm:$0xff] }
 0xaac   :  { %725 = vrot.lane.b32.xlu1 %v723_v52, %s1531_s5 }
 0xb1e   :  { %v726_v53 = vpop.permute.xlu1 %725 }
 0xb1f   :  { %1380 = vmatmul.mubr.msk.f32.vlgmr.msra.gmra.mrb[8].mxu0 %vm341_vm8, %v726_v53 }
 0xb20   :  { %1464 = vmatpush3.bf16.msra.mxu0 %v1609_v10  ;;  %1401 = vmatprep.mubr.msk.f32.mxu0 %vm1527_vm3, %v1528_v6 }
 0xb21   :  { %1465 = vmatprep.subr.bf16.mxu0 %v1526_v3 }
 0xb24   :  { %1467 = vmatpush3.bf16.msra.mxu0 %v1622_v14 }
 0xb25   :  { %1474 = vmatprep.subr.bf16.mxu0 %v1526_v3 }
 0xbf2   :  { %v795_v54 = vpop.f32.mrb[8].mxu0 }
 0xbf3   :  { %v799_v55 = vadd.f32 %v795_v54, %v1695_v43  ;;  %v1381_v56 = vpop.f32.mrb[9].mxu0 }
 0xbf5   :  { %1510 = vtanh.f32 %v799_v55 }
 0xbff   :  { %v1511_v57 = vpop.eup %1510 }
 0xc00   :  { %v801_v58 = vmul.f32 %v1511_v57, %v1701_v49 }
 0xc02   :  { %v802_v59 = vadd.f32 %v801_v58, %v1703_v51 }
 0xc04   :  { %805 = vrot.lane.b32.xlu0 %v802_v59, %s1530_s0  ;;  %v803_v62 = vmul.f32 %v802_v59, %v717_v48 }
 0xc76   :  { %v806_v60 = vpop.permute.xlu0 %805 }
 0xc77   :  { %v808_v61 = vmul.f32 %v806_v60, %v802_v59 }
 0xc79   :  { %810 = vrot.lane.b32.xlu1 %v808_v61, %s1531_s5 }
 0xceb   :  { %v811_v63 = vpop.permute.xlu1 %810 }
 0xcec   :  { %v813_v0 = vadd.f32 %v811_v63, %v803_v62 }
 0xcee   :  { %1512 = vtanh.f32 %v813_v0 }
 0xcf8   :  { %v1513_v1 = vpop.eup %1512 }
 0xcf9   :  { %816 = vrot.lane.b32.xlu0 %v1513_v1, %s1530_s0 }
 0xd6b   :  { %v817_v43 = vpop.permute.xlu0 %816 }
 0xd6c   :  { %v819_v2 = vmul.f32 %v817_v43, %v802_v59 }
 0xd6e   :  { %821 = vrot.lane.b32.xlu1 %v819_v2, %s1531_s5 }
 0xde0   :  { %v822_v4 = vpop.permute.xlu1 %821 }
 0xde1   :  { %1391 = vmatmul.mubr.msk.f32.vlgmr.msra.gmra.mrb[8].mxu1 %vm341_vm8, %v822_v4 }
 0xde2   :  { %1470 = vmatpush3.bf16.msra.mxu1 %v1609_v10  ;;  %1412 = vmatprep.mubr.msk.f32.mxu1 %vm1527_vm3, %v1528_v6 }
 0xde3   :  { %1471 = vmatprep.subr.bf16.mxu1 %v1526_v3 }
 0xde6   :  { %1473 = vmatpush3.bf16.msra.mxu1 %v1622_v14 }
 0xeb4   :  { %v891_v5 = vpop.f32.mrb[8].mxu1 }
 0xeb5   :  { %v895_v7 = vadd.f32 %v891_v5, %v1693_v41  ;;  %v1392_v8 = vpop.f32.mrb[9].mxu1 }
 0xeb7   :  { %1514 = vtanh.f32 %v895_v7 }
 0xec1   :  { %v1515_v9 = vpop.eup %1514 }
 0xec2   :  { %v897_v11 = vmul.f32 %v1515_v9, %v1701_v49 }
 0xec4   :  { %v898_v12 = vadd.f32 %v897_v11, %v1703_v51 }
 0xec6   :  { %901 = vrot.lane.b32.xlu0 %v898_v12, %s1530_s0  ;;  %v899_v15 = vmul.f32 %v898_v12, %v813_v0 }
 0xf38   :  { %v902_v10 = vpop.permute.xlu0 %901 }
 0xf39   :  { %v904_v13 = vmul.f32 %v902_v10, %v898_v12 }
 0xf3b   :  { %906 = vrot.lane.b32.xlu1 %v904_v13, %s1531_s5 }
 0xfad   :  { %v907_v16 = vpop.permute.xlu1 %906 }
 0xfae   :  { %v909_v17 = vadd.f32 %v907_v16, %v899_v15 }
 0xfb0   :  { %1516 = vtanh.f32 %v909_v17 }
 0xfba   :  { %v1517_v14 = vpop.eup %1516 }
 0xfbb   :  { %912 = vrot.lane.b32.xlu0 %v1517_v14, %s1530_s0 }
0x102d   :  { %v913_v41 = vpop.permute.xlu0 %912 }
0x102e   :  { %v915_v18 = vmul.f32 %v913_v41, %v898_v12 }
0x1030   :  { %917 = vrot.lane.b32.xlu1 %v915_v18, %s1531_s5 }
0x10a2   :  { %v918_v19 = vpop.permute.xlu1 %917 }
0x10a3   :  { %1402 = vmatmul.mubr.msk.f32.vlgmr.msra.gmra.mrb[10].mxu0 %vm341_vm8, %v918_v19 }
0x10a4   :  { %1423 = vmatprep.mubr.msk.f32.mxu0 %vm1527_vm3, %v1528_v6 }
0x1176   :  { %v987_v20 = vpop.f32.mrb[10].mxu0 }
0x1177   :  { %v991_v21 = vadd.f32 %v987_v20, %v1699_v47  ;;  %v1403_v22 = vpop.f32.mrb[11].mxu0 }
0x1179   :  { %1518 = vtanh.f32 %v991_v21 }
0x1183   :  { %v1519_v23 = vpop.eup %1518 }
0x1184   :  { %v993_v24 = vmul.f32 %v1519_v23, %v1701_v49 }
0x1186   :  { %v994_v25 = vadd.f32 %v993_v24, %v1703_v51 }
0x1188   :  { %997 = vrot.lane.b32.xlu0 %v994_v25, %s1530_s0  ;;  %v995_v28 = vmul.f32 %v994_v25, %v909_v17 }
0x11fa   :  { %v998_v26 = vpop.permute.xlu0 %997 }
0x11fb   :  { %v1000_v27 = vmul.f32 %v998_v26, %v994_v25 }
0x11fd   :  { %1002 = vrot.lane.b32.xlu1 %v1000_v27, %s1531_s5 }
0x126f   :  { %v1003_v29 = vpop.permute.xlu1 %1002 }
0x1270   :  { %v1005_v30 = vadd.f32 %v1003_v29, %v995_v28 }
0x1272   :  { %1520 = vtanh.f32 %v1005_v30 }
0x127c   :  { %v1521_v6 = vpop.eup %1520 }
0x127d   :  { %1008 = vrot.lane.b32.xlu0 %v1521_v6, %s1530_s0 }
0x12ef   :  { %v1009_v47 = vpop.permute.xlu0 %1008 }
0x12f0   :  { %v1011_v31 = vmul.f32 %v1009_v47, %v994_v25 }
0x12f2   :  { %1013 = vrot.lane.b32.xlu1 %v1011_v31, %s1531_s5 }
0x1364   :  { %v1014_v32 = vpop.permute.xlu1 %1013 }
0x1365   :  { %1413 = vmatmul.mubr.msk.f32.vlgmr.msra.gmra.mrb[10].mxu1 %vm341_vm8, %v1014_v32 }
0x1438   :  { %v1083_v33 = vpop.f32.mrb[10].mxu1 }
0x1439   :  { %v1087_v34 = vadd.f32 %v1083_v33, %v1697_v45  ;;  %v1414_v35 = vpop.f32.mrb[11].mxu1  ;;  %v1115_v45 = vld [vmem:[%s1831_s6] sm:$0xff] }
0x143b   :  { %1522 = vtanh.f32 %v1087_v34 }
0x1445   :  { %v1523_v36 = vpop.eup %1522 }
0x1446   :  { %v1089_v38 = vmul.f32 %v1523_v36, %v1701_v49  ;;  %v1116_v49 = vld [vmem:[%s1831_s6 + $0x8] sm:$0xff] }
0x1447   :  { %v1475_v50 = vpack.c.bf16 %v1116_v49, %v1115_v45 }
0x1448   :  { %v1090_v39 = vadd.f32 %v1089_v38, %v1703_v51  ;;  %v1117_v51 = vld [vmem:[%s1831_s6 + $0x10] sm:$0xff] }
0x1449   :  { %1476 = vmatpush3.bf16.msra.mxu0 %v1475_v50  ;;  %v1478_v52 = vpack.c.bf16 %v1118_v37, %v1117_v51 }
0x144a   :  { %1093 = vrot.lane.b32.xlu0 %v1090_v39, %s1530_s0  ;;  %v1091_v44 = vmul.f32 %v1090_v39, %v1005_v30  ;;  %1477 = vmatprep.subr.bf16.mxu0 %v1526_v3  ;;  %v1234_v3 = vld [vmem:[%s1833_s7] ss:$0 sm:$0xff] }
0x144d   :  { %1479 = vmatpush3.bf16.msra.mxu0 %v1478_v52 }
0x14bc   :  { %v1094_v40 = vpop.permute.xlu0 %1093 }
0x14bd   :  { %v1096_v42 = vmul.f32 %v1094_v40, %v1090_v39 }
0x14bf   :  { %1098 = vrot.lane.b32.xlu1 %v1096_v42, %s1531_s5 }
0x1531   :  { %v1099_v46 = vpop.permute.xlu1 %1098 }
0x1532   :  { %v1101_v48 = vadd.f32 %v1099_v46, %v1091_v44 }
0x1534   :  { %1524 = vtanh.f32 %v1101_v48 }
0x153e   :  { %v1525_v53 = vpop.eup %1524 }
0x153f   :  { %1104 = vrot.lane.b32.xlu0 %v1525_v53, %s1530_s0 }
0x15b1   :  { %v1105_v54 = vpop.permute.xlu0 %1104 }
0x15b2   :  { %v1107_v55 = vmul.f32 %v1105_v54, %v1090_v39 }
0x15b4   :  { %1109 = vrot.lane.b32.xlu1 %v1107_v55, %s1531_s5 }
0x1626   :  { %v1110_v56 = vpop.permute.xlu1 %1109 }
0x1627   :  { %1112 = vst.msk [vmem:[%s1832_s8] sm:$0xff] %vm341_vm8, %v1110_v56  ;;  %1424 = vmatmul.mubr.msk.f32.vlgmr.msra.gmra.mrb[12].mxu0 %vm341_vm8, %v1110_v56 }
0x1628   :  { %1114 = vst.msk [vmem:[%s1832_s8] sm:$0xff] %vm1113_vm9, %v1101_v48 }
0x16fa   :  { %v1194_v57 = vpop.f32.mrb[12].mxu0 }
0x16fb   :  { %v1195_v58 = vadd.f32 %v1234_v3, %v1194_v57  ;;  %v1425_v59 = vpop.f32.mrb[13].mxu0 }
0x16fd   :  { %1199 = vrot.lane.b32.xlu0 %v1195_v58, %s1530_s0 }
0x176f   :  { %v1200_v60 = vpop.permute.xlu0 %1199 }
0x1770   :  { %1203 = vst.msk [vmem:[%s1832_s8] sm:$0xff] %vm1202_vm10, %v1200_v60 }

</bundles_post_ra>
